<compile_context>
chip_gen: v6e
topology: v6e:2x2x1
jax: 0.10.0
libtpu: 0.0.40
codegen_flags: <defaults>
</compile_context>

<pallas_src>
import math

import jax
import jax.numpy as jnp
from jax.experimental import pallas as pl
from jax.experimental.pallas import tpu as pltpu


def _round_up(x, m):
    return ((x + m - 1) // m) * m


def critic_kernel(state_ref, action_ref, w1s_ref, w1a_ref, b1_ref,
                  w2_ref, b2_ref, w3_ref, b3_ref, o_ref):
    """One batch tile of the critic forward pass (weights resident in VMEM)."""
    s = state_ref[...]                       # (TB, S) f32
    a = action_ref[...]                      # (TB, A) f32

    # fc1 + relu: concat fused as a split matmul, f32 accumulation on the MXU.
    h1 = jnp.dot(s, w1s_ref[...], preferred_element_type=jnp.float32)
    h1 = h1 + jnp.dot(a, w1a_ref[...], preferred_element_type=jnp.float32)
    h1 = jnp.maximum(h1 + b1_ref[...], 0.0)

    # dropout -> identity (eval mode)

    # fc2 + relu on the MXU.
    h2 = jnp.dot(h1, w2_ref[...], preferred_element_type=jnp.float32)
    h2 = jnp.maximum(h2 + b2_ref[...], 0.0)

    # fc3 (H -> 1): VPU multiply + lane reduction instead of an MXU push for a
    # single output column; b3 is a scalar read from SMEM.
    q = jnp.sum(h2 * w3_ref[...], axis=-1, keepdims=True) + b3_ref[0, 0]

    # Lane-dense store: broadcast the scalar column across 128 lanes so the
    # store path is unmasked; the wrapper slices back to (B, 1).
    o_ref[...] = jnp.broadcast_to(q, o_ref.shape)


def critic_forward(state, action, params, *, batch_tile=512):
    """state: (B, state_dim), action: (B, action_dim) -> (B, 1) float32."""
    w1s, w1a, b1, w2, b2, w3, b3 = params
    state = jnp.asarray(state, jnp.float32)
    action = jnp.asarray(action, jnp.float32)

    batch, state_dim = state.shape
    action_dim = action.shape[1]
    hidden_dim = w2.shape[0]

    # Batch tile: multiple of 8 (f32 sublane), capped at `batch_tile` rows.
    tb = min(batch_tile, _round_up(batch, 8))
    padded_batch = _round_up(batch, tb)
    if padded_batch != batch:
        pad = padded_batch - batch
        state = jnp.pad(state, ((0, pad), (0, 0)))
        action = jnp.pad(action, ((0, pad), (0, 0)))

    grid = (padded_batch // tb,)
    out_lanes = 128  # lane-dense output slab

    in_specs = [
        pl.BlockSpec((tb, state_dim), lambda i: (i, 0)),    # state tile
        pl.BlockSpec((tb, action_dim), lambda i: (i, 0)),   # action tile
        pl.BlockSpec(w1s.shape, lambda i: (0, 0)),          # W1[:S]  (resident)
        pl.BlockSpec(w1a.shape, lambda i: (0, 0)),          # W1[S:]  (resident)
        pl.BlockSpec(b1.shape, lambda i: (0, 0)),           # b1      (resident)
        pl.BlockSpec(w2.shape, lambda i: (0, 0)),           # W2      (resident)
        pl.BlockSpec(b2.shape, lambda i: (0, 0)),           # b2      (resident)
        pl.BlockSpec(w3.shape, lambda i: (0, 0)),           # W3 row  (resident)
        pl.BlockSpec(memory_space=pltpu.MemorySpace.SMEM),  # b3 scalar
    ]
    out_specs = pl.BlockSpec((tb, out_lanes), lambda i: (i, 0))

    # Advisory cost estimate for XLA's scheduler.
    flops = 2 * batch * ((state_dim + action_dim) * hidden_dim
                         + hidden_dim * hidden_dim + hidden_dim)
    bytes_accessed = int(
        state.nbytes + action.nbytes + sum(int(p.nbytes) for p in params)
        + padded_batch * out_lanes * 4)

    # VMEM budget: resident weights (worst-case double-buffered) + double-
    # buffered activation/output tiles + 1 MiB headroom; clamp well under
    # v7x's 64 MiB physical VMEM so double-buffering stays alive.
    weight_bytes = sum(int(p.nbytes) for p in (w1s, w1a, b1, w2, b2, w3))
    tile_bytes = tb * (state_dim + action_dim + out_lanes) * 4
    vmem_limit = min(48 * 1024 * 1024,
                     max(4 * 1024 * 1024,
                         2 * weight_bytes + 4 * tile_bytes + (1 << 20)))

    out = pl.pallas_call(
        critic_kernel,
        out_shape=jax.ShapeDtypeStruct((padded_batch, out_lanes), jnp.float32),
        grid=grid,
        in_specs=in_specs,
        out_specs=out_specs,
        compiler_params=pltpu.CompilerParams(
            dimension_semantics=("parallel",),   # shard batch across TCs
            vmem_limit_bytes=int(vmem_limit),
        ),
        cost_estimate=pl.CostEstimate(
            flops=int(flops),
            transcendentals=0,
            bytes_accessed=bytes_accessed),
    )(state, action, w1s, w1a, b1, w2, b2, w3, b3)

    return out[:batch, :1]


def kaiming_uniform_relu(key, out_features, in_features):
    """nn.init.kaiming_uniform_(w, nonlinearity='relu') for weight (out, in)."""
    gain = math.sqrt(2.0)
    bound = gain * math.sqrt(3.0 / in_features)
    return jax.random.uniform(
        key, (out_features, in_features), jnp.float32, minval=-bound, maxval=bound
    )


def init_critic_params(key, state_dim, action_dim, hidden_dim,
                       param_dtype=jnp.float32):
    """Weights in kernel layout. param_dtype=jnp.bfloat16 is a drop-in for
    v6e/v7x (kernel accumulates in f32); demo uses f32 for exact PyTorch
    numerics."""
    k1, k2, k3 = jax.random.split(key, 3)
    in_dim = state_dim + action_dim
    # PyTorch Linear weights: (out, in). Split/transposed for the kernel.
    w1 = kaiming_uniform_relu(k1, hidden_dim, in_dim)       # (H, S+A)
    w2 = kaiming_uniform_relu(k2, hidden_dim, hidden_dim)   # (H, H)
    w3 = kaiming_uniform_relu(k3, 1, hidden_dim)            # (1, H)

    w1s = w1[:, :state_dim].T.astype(param_dtype)           # (S, H)
    w1a = w1[:, state_dim:].T.astype(param_dtype)           # (A, H)
    w2t = w2.T.astype(param_dtype)                          # (H, H)
    w3r = w3.astype(param_dtype)                            # (1, H) row for VPU fc3

    b1 = jnp.zeros((1, hidden_dim), jnp.float32)
    b2 = jnp.zeros((1, hidden_dim), jnp.float32)
    b3 = jnp.zeros((1, 1), jnp.float32)                     # SMEM scalar
    return (w1s, w1a, b1, w2t, b2, w3r, b3)


def critic_reference(state, action, params):
    """Pure-JAX reference for correctness check."""
    w1s, w1a, b1, w2, b2, w3, b3 = params
    x = jnp.concatenate([state, action], axis=-1).astype(jnp.float32)
    w1 = jnp.concatenate([w1s, w1a], axis=0).astype(jnp.float32)   # (S+A, H)
    h = jnp.maximum(x @ w1 + b1, 0.0)
    h = jnp.maximum(h @ w2.astype(jnp.float32) + b2, 0.0)
    return h @ w3.astype(jnp.float32).T + b3


if __name__ == "__main__":
    state_dim, action_dim, hidden_dim = 8, 4, 32
    batch = 2

    key = jax.random.PRNGKey(0)
    k_params, k_state, k_action = jax.random.split(key, 3)

    params = init_critic_params(k_params, state_dim, action_dim, hidden_dim)
    state = jax.random.normal(k_state, (batch, state_dim), jnp.float32)
    action = jax.random.normal(k_action, (batch, action_dim), jnp.float32)

    q = critic_forward(state, action, params)
    q = jax.block_until_ready(q)

    q_ref = critic_reference(state, action, params)
    assert q.shape == (batch, 1), q.shape
    assert jnp.allclose(q, q_ref, atol=1e-5, rtol=1e-5), (q, q_ref)

    print("KERNEL_OK")
</pallas_src>

<mosaic_0001>
module attributes {stable_mosaic.version = 11 : i64} {
  func.func @critic_kernel(%arg0: i32, %arg1: memref<8x8xf32, #tpu.memory_space<vmem>>, %arg2: memref<8x4xf32, #tpu.memory_space<vmem>>, %arg3: memref<8x32xf32, #tpu.memory_space<vmem>>, %arg4: memref<4x32xf32, #tpu.memory_space<vmem>>, %arg5: memref<1x32xf32, #tpu.memory_space<vmem>>, %arg6: memref<32x32xf32, #tpu.memory_space<vmem>>, %arg7: memref<1x32xf32, #tpu.memory_space<vmem>>, %arg8: memref<1x32xf32, #tpu.memory_space<vmem>>, %arg9: memref<1x1xf32, #tpu.memory_space<smem>>, %arg10: memref<8x128xf32, #tpu.memory_space<vmem>>) attributes {dimension_semantics = [#tpu.dimension_semantics<parallel>], iteration_bounds = array<i64: 1>, scalar_prefetch = 0 : i64, scratch_operands = 0 : i64, tpu.core_type = #tpu.core_type<tc>, window_params = [{transform_indices = @transform_0, window_bounds = array<i64: 8, 8>}, {transform_indices = @transform_1, window_bounds = array<i64: 8, 4>}, {pipeline_mode = #tpu.pipeline_mode<synchronous>, transform_indices = @transform_2, window_bounds = array<i64: 8, 32>}, {pipeline_mode = #tpu.pipeline_mode<synchronous>, transform_indices = @transform_3, window_bounds = array<i64: 4, 32>}, {pipeline_mode = #tpu.pipeline_mode<synchronous>, transform_indices = @transform_4, window_bounds = array<i64: 1, 32>}, {pipeline_mode = #tpu.pipeline_mode<synchronous>, transform_indices = @transform_5, window_bounds = array<i64: 32, 32>}, {pipeline_mode = #tpu.pipeline_mode<synchronous>, transform_indices = @transform_6, window_bounds = array<i64: 1, 32>}, {pipeline_mode = #tpu.pipeline_mode<synchronous>, transform_indices = @transform_7, window_bounds = array<i64: 1, 32>}, {transform_indices = @transform_8, window_bounds = array<i64: 1, 1>}, {transform_indices = @transform_9, window_bounds = array<i64: 8, 128>}]} {
    %c0 = arith.constant 0 : index
    %c0_0 = arith.constant 0 : index
    %0 = vector.load %arg1[%c0, %c0_0] : memref<8x8xf32, #tpu.memory_space<vmem>>, vector<8x8xf32>
    %c0_1 = arith.constant 0 : index
    %c0_2 = arith.constant 0 : index
    %1 = vector.load %arg2[%c0_1, %c0_2] : memref<8x4xf32, #tpu.memory_space<vmem>>, vector<8x4xf32>
    %c0_3 = arith.constant 0 : index
    %c0_4 = arith.constant 0 : index
    %2 = vector.load %arg3[%c0_3, %c0_4] : memref<8x32xf32, #tpu.memory_space<vmem>>, vector<8x32xf32>
    %cst = arith.constant dense<0.000000e+00> : vector<8x32xf32>
    %3 = tpu.matmul %0, %2, %cst {dimension_numbers = #tpu.dot_dimension_numbers<[1], [0], [0], [1], [0, 0, 1, 1], [], []>} : vector<8x8xf32>, vector<8x32xf32>, vector<8x32xf32> -> vector<8x32xf32>
    %c0_5 = arith.constant 0 : index
    %c0_6 = arith.constant 0 : index
    %4 = vector.load %arg4[%c0_5, %c0_6] : memref<4x32xf32, #tpu.memory_space<vmem>>, vector<4x32xf32>
    %cst_7 = arith.constant dense<0.000000e+00> : vector<8x32xf32>
    %5 = tpu.matmul %1, %4, %cst_7 {dimension_numbers = #tpu.dot_dimension_numbers<[1], [0], [0], [1], [0, 0, 1, 1], [], []>} : vector<8x4xf32>, vector<4x32xf32>, vector<8x32xf32> -> vector<8x32xf32>
    %6 = arith.addf %3, %5 : vector<8x32xf32>
    %c0_8 = arith.constant 0 : index
    %c0_9 = arith.constant 0 : index
    %7 = vector.load %arg5[%c0_8, %c0_9] : memref<1x32xf32, #tpu.memory_space<vmem>>, vector<1x32xf32>
    %8 = vector.broadcast %7 : vector<1x32xf32> to vector<8x32xf32>
    %9 = arith.addf %6, %8 : vector<8x32xf32>
    %cst_10 = arith.constant 0.000000e+00 : f32
    %10 = vector.broadcast %cst_10 : f32 to vector<8x32xf32>
    %11 = arith.maximumf %9, %10 : vector<8x32xf32>
    %c0_11 = arith.constant 0 : index
    %c0_12 = arith.constant 0 : index
    %12 = vector.load %arg6[%c0_11, %c0_12] : memref<32x32xf32, #tpu.memory_space<vmem>>, vector<32x32xf32>
    %cst_13 = arith.constant dense<0.000000e+00> : vector<8x32xf32>
    %13 = tpu.matmul %11, %12, %cst_13 {dimension_numbers = #tpu.dot_dimension_numbers<[1], [0], [0], [1], [0, 0, 1, 1], [], []>} : vector<8x32xf32>, vector<32x32xf32>, vector<8x32xf32> -> vector<8x32xf32>
    %c0_14 = arith.constant 0 : index
    %c0_15 = arith.constant 0 : index
    %14 = vector.load %arg7[%c0_14, %c0_15] : memref<1x32xf32, #tpu.memory_space<vmem>>, vector<1x32xf32>
    %15 = vector.broadcast %14 : vector<1x32xf32> to vector<8x32xf32>
    %16 = arith.addf %13, %15 : vector<8x32xf32>
    %cst_16 = arith.constant 0.000000e+00 : f32
    %17 = vector.broadcast %cst_16 : f32 to vector<8x32xf32>
    %18 = arith.maximumf %16, %17 : vector<8x32xf32>
    %c0_17 = arith.constant 0 : index
    %c0_18 = arith.constant 0 : index
    %19 = vector.load %arg8[%c0_17, %c0_18] : memref<1x32xf32, #tpu.memory_space<vmem>>, vector<1x32xf32>
    %20 = vector.broadcast %19 : vector<1x32xf32> to vector<8x32xf32>
    %21 = arith.mulf %18, %20 : vector<8x32xf32>
    %cst_19 = arith.constant dense<0.000000e+00> : vector<8xf32>
    %22 = vector.multi_reduction <add>, %21, %cst_19 [1] : vector<8x32xf32> to vector<8xf32>
    %23 = vector.shape_cast %22 : vector<8xf32> to vector<8x1xf32>
    %c0_20 = arith.constant 0 : index
    %c0_21 = arith.constant 0 : index
    %24 = memref.load %arg9[%c0_20, %c0_21] : memref<1x1xf32, #tpu.memory_space<smem>>
    %25 = vector.broadcast %24 : f32 to vector<8x1xf32>
    %26 = arith.addf %23, %25 : vector<8x1xf32>
    %27 = vector.shape_cast %26 : vector<8x1xf32> to vector<8x1xf32>
    %28 = vector.broadcast %27 : vector<8x1xf32> to vector<8x128xf32>
    %c0_22 = arith.constant 0 : index
    %c0_23 = arith.constant 0 : index
    %29 = vector.load %arg10[%c0_22, %c0_23] : memref<8x128xf32, #tpu.memory_space<vmem>>, vector<8x128xf32>
    tpu.vector_store %arg10[%c0_22, %c0_23], %28 {strides = array<i32>} : memref<8x128xf32, #tpu.memory_space<vmem>>, vector<8x128xf32>,
    return
  }
  func.func @transform_0(%arg0: i32) -> (i32, i32) {
    %c0_i32 = arith.constant 0 : i32
    %c0_i32_0 = arith.constant 0 : i32
    return %arg0, %c0_i32 : i32, i32
  }
  func.func @transform_1(%arg0: i32) -> (i32, i32) {
    %c0_i32 = arith.constant 0 : i32
    %c0_i32_0 = arith.constant 0 : i32
    return %arg0, %c0_i32 : i32, i32
  }
  func.func @transform_2(%arg0: i32) -> (i32, i32) {
    %c0_i32 = arith.constant 0 : i32
    %c0_i32_0 = arith.constant 0 : i32
    %c0_i32_1 = arith.constant 0 : i32
    return %c0_i32, %c0_i32_0 : i32, i32
  }
  func.func @transform_3(%arg0: i32) -> (i32, i32) {
    %c0_i32 = arith.constant 0 : i32
    %c0_i32_0 = arith.constant 0 : i32
    %c0_i32_1 = arith.constant 0 : i32
    return %c0_i32, %c0_i32_0 : i32, i32
  }
  func.func @transform_4(%arg0: i32) -> (i32, i32) {
    %c0_i32 = arith.constant 0 : i32
    %c0_i32_0 = arith.constant 0 : i32
    %c0_i32_1 = arith.constant 0 : i32
    return %c0_i32, %c0_i32_0 : i32, i32
  }
  func.func @transform_5(%arg0: i32) -> (i32, i32) {
    %c0_i32 = arith.constant 0 : i32
    %c0_i32_0 = arith.constant 0 : i32
    %c0_i32_1 = arith.constant 0 : i32
    return %c0_i32, %c0_i32_0 : i32, i32
  }
  func.func @transform_6(%arg0: i32) -> (i32, i32) {
    %c0_i32 = arith.constant 0 : i32
    %c0_i32_0 = arith.constant 0 : i32
    %c0_i32_1 = arith.constant 0 : i32
    return %c0_i32, %c0_i32_0 : i32, i32
  }
  func.func @transform_7(%arg0: i32) -> (i32, i32) {
    %c0_i32 = arith.constant 0 : i32
    %c0_i32_0 = arith.constant 0 : i32
    %c0_i32_1 = arith.constant 0 : i32
    return %c0_i32, %c0_i32_0 : i32, i32
  }
  func.func @transform_8(%arg0: i32) -> (i32, i32) {
    %c0_i32 = arith.constant 0 : i32
    %c0_i32_0 = arith.constant 0 : i32
    %c0_i32_1 = arith.constant 0 : i32
    return %c0_i32, %c0_i32_0 : i32, i32
  }
  func.func @transform_9(%arg0: i32) -> (i32, i32) {
    %c0_i32 = arith.constant 0 : i32
    %c0_i32_0 = arith.constant 0 : i32
    return %arg0, %c0_i32 : i32, i32
  }
}

</mosaic_0001>

<bundles_post_ra>
// kernel: tpu_custom_call.1
= control target key start
LH: loop header
LB: loop body
LE: loop exit
PB: predicated region body
PF: predicated region fallthrough
CT: control target
= control target key end

     0   :  { %15 = vsyncpa [#allocation4], 0  ;;  %s539_s0 = inlined_call_operand.vmem [shape: f32[8,8], index: 0, kind: input, shape index: {}]   ;;  %s540_s1 = inlined_call_operand.vmem [shape: f32[8,4], index: 1, kind: input, shape index: {}]   ;;  %s541_s2 = inlined_call_operand.vmem [shape: f32[8,32], index: 2, kind: input, shape index: {}]   ;;  %s542_s3 = inlined_call_operand.hbm [shape: f32[4,32], index: 3, kind: input, shape index: {}]   ;;  %s543_s4 = inlined_call_operand.vmem [shape: f32[1,32], index: 4, kind: input, shape index: {}]   ;;  %s544_s5 = inlined_call_operand.hbm [shape: f32[32,32], index: 5, kind: input, shape index: {}]   ;;  %s545_s6 = inlined_call_operand.vmem [shape: f32[1,32], index: 6, kind: input, shape index: {}]   ;;  %s546_s7 = inlined_call_operand.vmem [shape: f32[1,32], index: 7, kind: input, shape index: {}]   ;;  %s547_s8 = inlined_call_operand.<no memory space> [shape: f32[1,1], index: 8, kind: input, shape index: {}]   ;;  %s548_s9 = inlined_call_operand.hbm [shape: f32[8,128], index: 9, kind: output, shape index: {}]  }
   0x1   :  { %16 = vsyncpa [#allocation7], 0 }
   0x2   :  { %17 = vsyncpa [#allocation5], 0  ;;  %s452_s30 = smov [#allocation3]   ;;  %s453_s11 = smov [#allocation6]  }
   0x3   :  { %s30_s10 = sshll.u32 %s452_s30, 4  ;;  %s41_s12 = sshll.u32 %s453_s11, 4  ;;  %s31_s10 = int_to_ptr.vmem [resolvable:$true] %s30_s10  ;;  %s42_s12 = int_to_ptr.vmem [resolvable:$true] %s41_s12 }
   0x4   :  { %s394_s13 = scalar_lea.vmem %s31_s10, 64  ;;  %p399_p1 = scmp.lt.s32.totalorder %s31_s10, %s31_s10 }
   0x5   :  { %p395_p0 = scmp.ne.s32.totalorder %s31_s10, %s394_s13  ;;  %p400_p2 = scmp.lt.s32.totalorder %s394_s13, %s394_s13 }
   0x7   :  { %p401_p3 = por %p400_p2, %p399_p1 }
   0x9   :  { %p402_p4 = pnand %p401_p3, %p395_p0 }
   0xb   :  { %405 = shalt.err (!%p402_p4)
}
   0xc   :  { %33 = dma.hbm_to_vmem [thread:$0]  %s542_s3, 64, %s31_s10, [#allocation4]  }
   0xd   :  { %s414_s16 = scalar_lea.vmem %s42_s12, 512  ;;  %p419_p6 = scmp.lt.s32.totalorder %s42_s12, %s42_s12 }
   0xe   :  { %p415_p5 = scmp.ne.s32.totalorder %s42_s12, %s414_s16  ;;  %p420_p7 = scmp.lt.s32.totalorder %s414_s16, %s414_s16 }
  0x10   :  { %p421_p8 = por %p420_p7, %p419_p6 }
  0x12   :  { %p422_p9 = pnand %p421_p8, %p415_p5 }
  0x14   :  { %425 = shalt.err (!%p422_p9)
}
  0x15   :  { %s454_s17 = smov 128   ;;  %s455_s18 = smov 8  }
  0x16   :  { %47 = dma.hbm_to_vmem [thread:$0]  %s544_s5, 512, %s42_s12, [#allocation7], %s454_s17, %s454_s17, %s455_s18  }
  0x17   :  { %446 = dma.done.wait [#allocation4], 64  }
  0x18   :  { %447 = vsyncadd [#allocation4], 4294967232 }
  0x19   :  { %448 = dma.done.wait [#allocation7], 512  }
  0x1a   :  { %449 = vsyncadd [#allocation7], 4294966784  ;;  %v456_v0 = vmov 0.0   ;;  %vm457_vm0 = vmmov 0   ;;  %vm68_vm1 = vcmask 1043456   ;;  %vm64_vm2 = vcmask 31744  }
  0x1b   :  { %358 = vmatprep.subr.mxu1 %v456_v0  ;;  %360 = vmatprep.mubr.msk.f32.mxu1 %vm457_vm0, %v456_v0  ;;  %v63_v1 = vld [vmem:[#allocation3] sm:$0xf]  ;;  %vm142_vm3 = vcmask 64512   ;;  %v227_v6 = vld [vmem:[#allocation6 + $0x10] sm:$0xff]  ;;  %v226_v7 = vld [vmem:[#allocation6 + $0x8] sm:$0xff]  ;;  %vm236_vm4 = vcmask 261120   ;;  %v323_v25 = vstv %s547_s8 }
  0x1c   :  { %368 = vmatprep.subr.mxu0 %v456_v0  ;;  %376 = vmatprep.mubr.msk.f32.mxu0 %vm457_vm0, %v456_v0  ;;  %v61_v2 = vld [vmem:[%s540_s1] sm:$0xff]  ;;  %s458_s29 = smov [#allocation8]  }
  0x1d   :  { %v62_v3 = vld [vmem:[%s541_s2] sm:$0xff]  ;;  %359 = vmatpush3.msk.msra.mxu1 %vm68_vm1, %v63_v1  ;;  %s332_s30 = sshll.u32 %s458_s29, 4  ;;  %s333_s30 = int_to_ptr.vmem [resolvable:$true] %s332_s30 }
  0x1e   :  { %361 = vmatmul.mubr.msk.f32.vlgmr.msra.gmra.mxu1 %vm64_vm2, %v61_v2  ;;  %363 = vmatprep.subr.mxu1 %v456_v0  ;;  %v60_v4 = vld [vmem:[%s539_s0] sm:$0xff]  ;;  %p431_p11 = scmp.lt.s32.totalorder %s333_s30, %s333_s30 }
  0x1f   :  { %364 = vmatpush3.msra.mxu1 %v62_v3  ;;  %365 = vmatprep.mubr.msk.f32.mxu1 %vm457_vm0, %v456_v0  ;;  %v228_v5 = vld [vmem:[#allocation6 + $0x18] sm:$0xff]  ;;  %v225_v8 = vld [vmem:[#allocation6] sm:$0xff] }
  0x20   :  { %369 = vmatpush3.msra.mxu0 %v228_v5  ;;  %v345_v12 = vld [vmem:[%s543_s4] ss:$0 sm:$0xff] }
  0x21   :  { %370 = vmatprep.subr.mxu0 %v456_v0  ;;  %v346_v17 = vld [vmem:[%s545_s6] ss:$0 sm:$0xff]  ;;  %s426_s6 = scalar_lea.vmem %s333_s30, 128 }
  0x22   :  { %366 = vmatmul.mubr.msk.f32.vlgmr.msra.gmra.mxu1 %vm142_vm3, %v60_v4  ;;  %371 = vmatpush3.msra.mxu0 %v227_v6  ;;  %v348_v21 = vld [vmem:[%s546_s7] ss:$0 sm:$0xff]  ;;  %p427_p10 = scmp.ne.s32.totalorder %s333_s30, %s426_s6  ;;  %p432_p12 = scmp.lt.s32.totalorder %s426_s6, %s426_s6 }
  0x23   :  { %372 = vmatprep.subr.mxu0 %v456_v0 }
  0x24   :  { %373 = vmatpush3.msra.mxu0 %v226_v7  ;;  %p433_p13 = por %p432_p12, %p431_p11 }
  0x25   :  { %374 = vmatprep.subr.mxu0 %v456_v0 }
  0x26   :  { %375 = vmatpush3.msra.mxu0 %v225_v8  ;;  %p434_p0 = pnand %p433_p13, %p427_p10 }
  0xde   :  { %v138_v9 = vpop.f32.mrf.mxu1 }
  0xe0   :  { %v362_v10 = vpop.f32.mrf.mxu1 }
  0xe2   :  { %v212_v11 = vpop.f32.mrf.mxu1 }
  0xe3   :  { %v213_v13 = vadd.f32 %v212_v11, %v138_v9 }
  0xe4   :  { %v367_v14 = vpop.f32.mrf.mxu1 }
  0xe5   :  { %v223_v15 = vadd.f32 %v345_v12, %v213_v13 }
  0xe7   :  { %v224_v16 = vmax.f32 %v223_v15, 0.0 }
  0xe9   :  { %377 = vmatmul.mubr.msk.f32.vlgmr.msra.gmra.mxu0 %vm236_vm4, %v224_v16 }
 0x1a9   :  { %v306_v18 = vpop.f32.mrf.mxu0 }
 0x1aa   :  { %v307_v19 = vadd.f32 %v346_v17, %v306_v18 }
 0x1ab   :  { %v378_v20 = vpop.f32.mrf.mxu0 }
 0x1ac   :  { %v310_v22 = vmax.f32 %v307_v19, 0.0 }
 0x1ae   :  { %v318_v23 = vmul.f32 %v348_v21, %v310_v22 }
 0x1b0   :  { %v319_v24 = vsel %vm236_vm4, %v318_v23, 0.0 }
 0x1b1   :  { %320 = vadd.xlane.f32.xlu0 %v319_v24 }
 0x23a   :  { %v321_v26 = vpop.xlane.xlu0 %320 }
 0x23b   :  { %v324_v27 = vadd.f32 %v323_v25, %v321_v26 }
 0x23d   :  { %325 = vst [vmem:[#allocation8] sm:$0xff] %v324_v27 }
 0x23e   :  { %437 = shalt.err (!%p434_p0)
}
 0x23f   :  { %335 = dma.vmem_to_hbm [thread:$0]  %s333_s30, 128, %s548_s9, [#allocation5]  }
 0x240   :  { %450 = dma.done.wait [#allocation5], 128  }
 0x241   :  { %451 = vsyncadd [#allocation5], 4294967168 }
 0x242   :  { %339 = vsyncpa [#allocation4], 1 }
 0x243   :  { %340 = vsyncpa [#allocation7], 1 }
 0x244   :  { %341 = vsyncpa [#allocation5], 1 }

</bundles_post_ra>
